<compile_context>
chip_gen: v5e
topology: v5e:2x2
jax: 0.10.0
libtpu: 0.0.40
codegen_flags: <defaults>
</compile_context>

<pallas_src>
import jax
import jax.numpy as jnp
from jax.experimental import pallas as pl
from jax.experimental.pallas import tpu as pltpu


_TARGET_BLOCK_BYTES = 2 * 1024 * 1024    # ~2 MiB blocks: near HBM-BW plateau,
                                         # 4 live blocks (in+out, double-buffered)
                                         # ~= 8 MiB -> fits v7x 64 MiB VMEM.
_VMEM_LIMIT_BYTES = 32 * 1024 * 1024     # v5e scoped default is only 16 MiB;
                                         # keep this override (do not remove).
_MAX_LANE_WIDTH = 4096                   # cap for the lane-dense flat view.
_MULTI_STEP_MIN_BYTES = 1024 * 1024      # only force >=2 grid steps (v7x dual
                                         # TC sharding) when there is real data.


def _affine_scalar_kernel(params_ref, x_ref, o_ref):
    """out = x * scale + shift; scale/shift are f32 scalars read from SMEM."""
    x = x_ref[...].astype(jnp.float32)
    o_ref[...] = (x * params_ref[0] + params_ref[1]).astype(o_ref.dtype)


def _affine_rows_kernel(x_ref, scale_ref, shift_ref, o_ref):
    """out = x * scale + shift with per-row (rows_tile, 1) scale/shift columns."""
    x = x_ref[...].astype(jnp.float32)
    o_ref[...] = (x * scale_ref[...] + shift_ref[...]).astype(o_ref.dtype)


def _pick_tiles(rows, cols, itemsize, sublane, want_multi_step):
    """Choose (rows_tile, cols_tile, grid) for a (rows, cols) elementwise pass.

    Blocks target ~_TARGET_BLOCK_BYTES, respect the (sublane, 128) block-shape
    constraint (or full extent), and ragged tails are covered with cdiv grids
    (masked boundary blocks) instead of any whole-array fallback.  When the
    array is large and the column axis is not split, the row tile is capped so
    the parallel grid has >= 2 steps for v7x's two TensorCores.
    """
    min_rows = min(rows, sublane)
    # Column (lane) tile: prefer full width (one DMA row span); split only in
    # multiples of 128 when even a single sublane-group of rows is too big.
    if cols * itemsize * min_rows <= _TARGET_BLOCK_BYTES:
        cols_tile = cols
    else:
        cols_tile = (_TARGET_BLOCK_BYTES // (itemsize * min_rows)) // 128 * 128
        cols_tile = max(128, min(cols_tile, cols))
    grid_cols = pl.cdiv(cols, cols_tile)

    # Row (sublane) tile.
    if rows <= sublane:
        rows_tile = rows                      # full extent (tiny inputs)
    else:
        cap = max(1, _TARGET_BLOCK_BYTES // (cols_tile * itemsize))
        if want_multi_step and grid_cols == 1:
            cap = min(cap, pl.cdiv(rows, 2))  # guarantee >= 2 grid steps
        rows_tile = max(sublane, (cap // sublane) * sublane)
        if rows_tile >= rows:
            rows_tile = rows
    grid_rows = pl.cdiv(rows, rows_tile)
    return rows_tile, cols_tile, (grid_rows, grid_cols)


def _lane_dense_view_width(total):
    """Largest multiple-of-128 divisor of `total` (<= _MAX_LANE_WIDTH),
    preferring a width that leaves >= 8 rows; None if no such divisor."""
    for need_rows in (8, 1):
        for width in range(_MAX_LANE_WIDTH, 0, -128):
            if total % width == 0 and total // width >= need_rows:
                return width
    return None


def normalization_forward(x, mean, sigma, out_dtype=None):
    """Pallas TPU forward of PyTorch `Normalization`: (x - mean) / sigma.

    x: (N, C, H, W); mean, sigma: (1, Cp, 1, 1) with Cp in {1, C}.
    out_dtype=None matches PyTorch promotion against the f32 parameters; pass
    out_dtype=x.dtype to avoid the f32 write for bf16 inputs (HBM-bound op).
    """
    N, C, H, W = x.shape
    total = N * C * H * W
    if out_dtype is None:
        out_dtype = jnp.promote_types(x.dtype, jnp.float32)

    mean_flat = mean.reshape(-1).astype(jnp.float32)
    sigma_flat = sigma.reshape(-1).astype(jnp.float32)
    cp = mean_flat.shape[0]
    assert sigma_flat.shape[0] == cp and cp in (1, C), (
        "mean/sigma must broadcast over the channel dimension")

    # (x - m) / s  ==  x * (1/s) + (-m/s), precomputed in f32 (one VPU FMA).
    scale_c = 1.0 / sigma_flat
    shift_c = -mean_flat * scale_c

    itemsize = jnp.dtype(x.dtype).itemsize
    out_itemsize = jnp.dtype(out_dtype).itemsize
    sublane = max(8, 32 // itemsize)          # 8 for f32, 16 for bf16
    want_multi_step = total * itemsize >= _MULTI_STEP_MIN_BYTES

    cost = pl.CostEstimate(
        flops=2 * total,
        transcendentals=0,
        bytes_accessed=total * (itemsize + out_itemsize))
    compiler_params = pltpu.CompilerParams(
        dimension_semantics=("parallel", "parallel"),
        vmem_limit_bytes=_VMEM_LIMIT_BYTES)

    if cp == 1:
        # ---- Scalar-parameter fast path (module default). ----
        width = _lane_dense_view_width(total)
        if width is None:
            rows, cols = N * C, H * W          # no 128-divisor: masked tail vst
        else:
            rows, cols = total // width, width  # fully lane-dense, unmasked vst
        x2d = x.reshape(rows, cols)
        rows_tile, cols_tile, grid = _pick_tiles(
            rows, cols, itemsize, sublane, want_multi_step)
        params = jnp.concatenate([scale_c, shift_c])   # (2,) f32 -> SMEM

        out2d = pl.pallas_call(
            _affine_scalar_kernel,
            out_shape=jax.ShapeDtypeStruct((rows, cols), out_dtype),
            grid=grid,
            in_specs=[
                pl.BlockSpec(memory_space=pltpu.MemorySpace.SMEM),
                pl.BlockSpec((rows_tile, cols_tile), lambda i, j: (i, j)),
            ],
            out_specs=pl.BlockSpec((rows_tile, cols_tile), lambda i, j: (i, j)),
            compiler_params=compiler_params,
            cost_estimate=cost,
        )(params, x2d)
        return out2d.reshape(N, C, H, W)

    # ---- Per-channel path: (N*C, H*W) view, per-row scale/shift columns. ----
    rows, cols = N * C, H * W
    x2d = x.reshape(rows, cols)
    scale_rows = jnp.tile(scale_c, N).reshape(rows, 1)   # row r -> channel r % C
    shift_rows = jnp.tile(shift_c, N).reshape(rows, 1)
    rows_tile, cols_tile, grid = _pick_tiles(
        rows, cols, itemsize, sublane, want_multi_step)

    out2d = pl.pallas_call(
        _affine_rows_kernel,
        out_shape=jax.ShapeDtypeStruct((rows, cols), out_dtype),
        grid=grid,
        in_specs=[
            pl.BlockSpec((rows_tile, cols_tile), lambda i, j: (i, j)),
            pl.BlockSpec((rows_tile, 1), lambda i, j: (i, 0)),
            pl.BlockSpec((rows_tile, 1), lambda i, j: (i, 0)),
        ],
        out_specs=pl.BlockSpec((rows_tile, cols_tile), lambda i, j: (i, j)),
        compiler_params=compiler_params,
        cost_estimate=cost,
    )(x2d, scale_rows, shift_rows)
    return out2d.reshape(N, C, H, W)


if __name__ == "__main__":
    # Module defaults: mean=0.1307, sigma=0.3081 -> parameters of shape (1,1,1,1).
    mean_param = jnp.asarray([0.1307], dtype=jnp.float32).reshape(1, -1, 1, 1)
    sigma_param = jnp.asarray([0.3081], dtype=jnp.float32).reshape(1, -1, 1, 1)

    key = jax.random.PRNGKey(0)
    x = jax.random.normal(key, (2, 4, 16, 16), dtype=jnp.float32)  # NCHW

    out = jax.block_until_ready(normalization_forward(x, mean_param, sigma_param))
    ref = (x - mean_param) / sigma_param
    assert out.shape == x.shape and out.dtype == ref.dtype
    assert jnp.allclose(out, ref, rtol=1e-5, atol=1e-5)

    # Per-channel (list-style) parameters exercise the second path as well.
    mean_c = jnp.asarray([0.1, -0.2, 0.3, 0.05], jnp.float32).reshape(1, -1, 1, 1)
    sigma_c = jnp.asarray([0.5, 0.25, 1.5, 2.0], jnp.float32).reshape(1, -1, 1, 1)
    out_c = jax.block_until_ready(normalization_forward(x, mean_c, sigma_c))
    ref_c = (x - mean_c) / sigma_c
    assert jnp.allclose(out_c, ref_c, rtol=1e-5, atol=1e-5)

    print("KERNEL_OK")
</pallas_src>

<mosaic_0001>
module attributes {stable_mosaic.version = 11 : i64} {
  func.func @_affine_scalar_kernel(%arg0: i32, %arg1: i32, %arg2: memref<2xf32, #tpu.memory_space<smem>>, %arg3: memref<8x256xf32, #tpu.memory_space<vmem>>, %arg4: memref<8x256xf32, #tpu.memory_space<vmem>>) attributes {dimension_semantics = [#tpu.dimension_semantics<parallel>, #tpu.dimension_semantics<parallel>], iteration_bounds = array<i64: 1, 1>, scalar_prefetch = 0 : i64, scratch_operands = 0 : i64, tpu.core_type = #tpu.core_type<tc>, window_params = [{transform_indices = @transform_0, window_bounds = array<i64: 2>}, {transform_indices = @transform_1, window_bounds = array<i64: 8, 256>}, {transform_indices = @transform_2, window_bounds = array<i64: 8, 256>}]} {
    %c0 = arith.constant 0 : index
    %c0_0 = arith.constant 0 : index
    %0 = vector.load %arg3[%c0, %c0_0] : memref<8x256xf32, #tpu.memory_space<vmem>>, vector<8x256xf32>
    %c0_1 = arith.constant 0 : index
    %1 = memref.load %arg2[%c0_1] : memref<2xf32, #tpu.memory_space<smem>>
    %2 = vector.broadcast %1 : f32 to vector<8x256xf32>
    %3 = arith.mulf %0, %2 : vector<8x256xf32>
    %c1 = arith.constant 1 : index
    %4 = memref.load %arg2[%c1] : memref<2xf32, #tpu.memory_space<smem>>
    %5 = vector.broadcast %4 : f32 to vector<8x256xf32>
    %6 = arith.addf %3, %5 : vector<8x256xf32>
    %c0_2 = arith.constant 0 : index
    %c0_3 = arith.constant 0 : index
    %7 = vector.load %arg4[%c0_2, %c0_3] : memref<8x256xf32, #tpu.memory_space<vmem>>, vector<8x256xf32>
    tpu.vector_store %arg4[%c0_2, %c0_3], %6 {strides = array<i32>} : memref<8x256xf32, #tpu.memory_space<vmem>>, vector<8x256xf32>,
    return
  }
  func.func @transform_0(%arg0: i32, %arg1: i32) -> i32 {
    %c0_i32 = arith.constant 0 : i32
    %c0_i32_0 = arith.constant 0 : i32
    return %c0_i32 : i32
  }
  func.func @transform_1(%arg0: i32, %arg1: i32) -> (i32, i32) {
    %c0_i32 = arith.constant 0 : i32
    return %arg0, %arg1 : i32, i32
  }
  func.func @transform_2(%arg0: i32, %arg1: i32) -> (i32, i32) {
    %c0_i32 = arith.constant 0 : i32
    return %arg0, %arg1 : i32, i32
  }
}

</mosaic_0001>

<bundles_post_ra>
// kernel: tpu_custom_call.1
= control target key start
LH: loop header
LB: loop body
LE: loop exit
PB: predicated region body
PF: predicated region fallthrough
CT: control target
= control target key end

     0   :  { %7 = vsyncpa [#allocation5], 0  ;;  %s166_s0 = inlined_call_operand.hbm [shape: f32[2], index: 0, kind: input, shape index: {}]   ;;  %s167_s1 = inlined_call_operand.hbm [shape: f32[8,256], index: 1, kind: input, shape index: {}]   ;;  %s168_s2 = inlined_call_operand.hbm [shape: f32[8,256], index: 2, kind: output, shape index: {}]  }
   0x1   :  { %8 = vsyncpa [#allocation3], 0 }
   0x2   :  { %9 = vsyncpa [#allocation4], 0  ;;  %s15_s11 = sshll.u32 %s166_s0, 4  ;;  %s24_s14 = sshll.u32 %s167_s1, 4  ;;  %s16_s11 = int_to_ptr.hbm [resolvable:$true] %s15_s11  ;;  %s25_s14 = int_to_ptr.hbm [resolvable:$true] %s24_s14 }
   0x3   :  { %s139_s15 = smov [#allocation2]   ;;  %s140_s16 = smov [#allocation6]  }
   0x4   :  { %18 = dma.hbm_to_smem %s16_s11, 16, %s139_s15, [#allocation5]  }
   0x5   :  { %s26_s17 = sshll.u32 %s140_s16, 4  ;;  %s27_s17 = int_to_ptr.vmem [resolvable:$true] %s26_s17 }
   0x6   :  { %29 = dma.hbm_to_vmem [thread:$0]  %s25_s14, 256, %s27_s17, [#allocation3]  }
   0x7   :  { %133 = dma.done.wait [#allocation5], 16  }
   0x8   :  { %134 = vsyncadd [#allocation5], 4294967280 }
   0x9   :  { %135 = dma.done.wait [#allocation3], 256  }
   0xa   :  { %136 = vsyncadd [#allocation3], 4294967040 }
   0xb   :  { %38 = sfence }
   0xc   :  { %s41_s18 = sld [smem:[#allocation2]]  ;;  %v39_v0 = vld [vmem:[#allocation6] sm:$0xff]  ;;  %v40_v1 = vld [vmem:[#allocation6 + $0x8] sm:$0xff]  ;;  %s141_s0 = smov [#allocation7]  }
   0xd   :  { %s69_s19 = sld [smem:[#allocation2 + $0x1]]  ;;  %s56_s1 = sshll.u32 %s141_s0, 4  ;;  %s57_s1 = int_to_ptr.vmem [resolvable:$true] %s56_s1 }
   0xe   :  { %s58_s22 = sshll.u32 %s168_s2, 4  ;;  %s59_s22 = int_to_ptr.hbm [resolvable:$true] %s58_s22 }
  0x12   :  { %v42_v2 = vstv %s41_s18 }
  0x13   :  { %v43_v3 = vmul.f32 %v42_v2, %v39_v0  ;;  %v46_v4 = vstv %s69_s19  ;;  %v44_v5 = vmul.f32 %v42_v2, %v40_v1 }
  0x15   :  { %v47_v6 = vadd.f32 %v46_v4, %v43_v3  ;;  %v48_v7 = vadd.f32 %v46_v4, %v44_v5 }
  0x17   :  { %49 = vst [vmem:[#allocation7] sm:$0xff] %v47_v6 }
  0x18   :  { %50 = vst [vmem:[#allocation7 + $0x8] sm:$0xff] %v48_v7 }
  0x19   :  { %61 = dma.vmem_to_hbm [thread:$0]  %s57_s1, 256, %s59_s22, [#allocation4]  }
  0x1a   :  { %137 = dma.done.wait [#allocation4], 256  }
  0x1b   :  { %138 = vsyncadd [#allocation4], 4294967040 }
  0x1c   :  { %66 = vsyncpa [#allocation3], 1 }
  0x1d   :  { %67 = vsyncpa [#allocation4], 1 }
  0x1e   :  { %68 = vsyncpa [#allocation5], 1 }

</bundles_post_ra>
